<compile_context>
chip_gen: v5e
topology: v5e:2x2
jax: 0.10.0
libtpu: 0.0.40
codegen_flags: <defaults>
</compile_context>

<pallas_src>
import jax
import jax.numpy as jnp
from jax.experimental import pallas as pl
from jax.experimental.pallas import tpu as pltpu


# ----------------------------------------------------------------------------
# Fused kernel: one wide matmul per layer on a branch-concatenated lane slab.
# ----------------------------------------------------------------------------
def _make_fused_kernel(n_layers, compute_dtype):
    compute_dtype = jnp.dtype(compute_dtype)

    def kernel(*refs):
        # refs = (x, w_0, b_0, ..., w_{L-1}, b_{L-1}, out)
        x_ref = refs[0]
        wb_refs = refs[1:1 + 2 * n_layers]
        out_ref = refs[1 + 2 * n_layers]

        h = x_ref[...]                         # (TB, Din), already compute_dtype
        for i in range(n_layers):
            w = wb_refs[2 * i][...]            # (K_i, N_i), compute_dtype
            b = wb_refs[2 * i + 1][...]        # (1,  N_i), f32
            h = jnp.dot(h, w, preferred_element_type=jnp.float32) + b
            if i < n_layers - 1:
                h = jnp.maximum(h, 0.0)        # hidden sub-nets: ReLU (f32)
                if compute_dtype != jnp.float32:
                    h = h.astype(compute_dtype)
        out_ref[...] = h.astype(out_ref.dtype)  # single lane-dense store

    return kernel


# ----------------------------------------------------------------------------
# Wrapper-side weight folding (one-time, amortized over all batch tiles).
# ----------------------------------------------------------------------------
def _fold_params(weights, biases, cs_units, compute_dtype):
    """Fold cross-stitch into next-layer weights; concat branches along lanes.

    Lane layout of the activation slab after layer i: [h_0 | h_1 | ... | h_{S-1}],
    each block of width D_i.  Layer i+1's branch-j input is sum_k cs[j,k]*h_k,
    so W_eff block (k, j) = cs[j, k] * W_{i+1}[j].
    """
    n_layers = len(weights)
    weights = list(weights)
    biases = list(biases)
    # Only output feature 0 of the last layer is consumed (results[:, 0, :]).
    weights[-1] = weights[-1][:, :, 0:1]
    biases[-1] = biases[-1][:, 0:1]

    eff_w, eff_b = [], []
    for i in range(n_layers):
        w = weights[i]                          # (S, K_i, N_i)
        s, k, n = w.shape
        if i == 0:
            # Every branch consumes the same x -> concat along output lanes.
            we = jnp.transpose(w, (1, 0, 2)).reshape(k, s * n)
        else:
            cs = cs_units[i - 1]                # (S, S): in_j = sum_k cs[j,k]*h_k
            # Pure broadcast-multiply (no contraction): [k, m, j, n] layout,
            # rows = (src branch k, feature m), cols = (dst branch j, feature n).
            we = jnp.einsum('jk,jmn->kmjn', cs, w).reshape(s * k, s * n)
        eff_w.append(we.astype(compute_dtype))
        eff_b.append(biases[i].reshape(1, s * n).astype(jnp.float32))
    return eff_w, eff_b


def _choose_batch_tile(batch):
    """Pick (b_pad, tb): tiles up to 2048 rows, >=2 grid steps for non-trivial
    batches (v7x has two TensorCores), and minimal padding waste (tb chosen to
    near-divide the 8-aligned batch, e.g. 1040 -> 2 x 520)."""
    if batch < 128:
        return batch, batch                     # single full-array block
    b8 = -(-batch // 8) * 8
    max_tb = 2048
    n_steps = max(2, -(-b8 // max_tb))
    tb = -(-b8 // n_steps)
    tb = -(-tb // 8) * 8
    return tb * n_steps, tb


def _vmem_limit_bytes(tb, d_in, split, eff_w, compute_dtype):
    """Conservative VMEM estimate (padded to (8,128) tiles, double-buffered)."""
    def tile(r, c, itemsize):
        return (-(-r // 8) * 8) * (-(-c // 128) * 128) * itemsize

    cb = jnp.dtype(compute_dtype).itemsize
    total = 2 * tile(tb, d_in, cb) + 2 * tile(tb, split, 4)
    widest = d_in
    for w in eff_w:
        k, n = w.shape
        widest = max(widest, n)
        total += 2 * (tile(k, n, cb) + tile(1, n, 4))
    total += 4 * tile(tb, widest, 4)            # live-activation headroom
    return int(min(64 << 20, max(32 << 20, 2 * total)))


def flexible_cross_stitch_forward(x, params, split, compute_dtype=jnp.float32):
    """Mirrors FlexibleCrossStitch.forward with one fused Pallas kernel."""
    compute_dtype = jnp.dtype(compute_dtype)
    if x.ndim < 2:
        x = x[None, :]
    batch, d_in = x.shape

    eff_w, eff_b = _fold_params(params["weights"], params["biases"],
                                params["cross_stitch"], compute_dtype)
    n_layers = len(eff_w)

    b_pad, tb = _choose_batch_tile(batch)
    # Cast x wrapper-side (halves the dominant HBM traffic when bf16).
    x_in = x.astype(compute_dtype)
    if b_pad != batch:
        x_in = jnp.pad(x_in, ((0, b_pad - batch), (0, 0)))

    in_specs = [pl.BlockSpec((tb, d_in), lambda i: (i, 0))]
    args = [x_in]
    for w, b in zip(eff_w, eff_b):
        # Constant index_map -> weights/biases stay VMEM-resident across the
        # batch grid (no re-DMA).  (pipeline_mode=pl.Buffered(1) could halve
        # their footprint on v7x if the real sub-nets were large.)
        in_specs.append(pl.BlockSpec(w.shape, lambda i: (0, 0)))
        in_specs.append(pl.BlockSpec(b.shape, lambda i: (0, 0)))
        args += [w, b]

    kernel = _make_fused_kernel(n_layers, compute_dtype)
    out = pl.pallas_call(
        kernel,
        out_shape=jax.ShapeDtypeStruct((b_pad, split), jnp.float32),
        grid=(b_pad // tb,),
        in_specs=in_specs,
        out_specs=pl.BlockSpec((tb, split), lambda i: (i, 0)),
        compiler_params=pltpu.CompilerParams(
            dimension_semantics=("parallel",),
            vmem_limit_bytes=_vmem_limit_bytes(tb, d_in, split, eff_w,
                                               compute_dtype)),
    )(*args)
    return out[:batch]


# ----------------------------------------------------------------------------
# Parameters (deterministic synthetic sub-nets) + pure-JAX reference
# ----------------------------------------------------------------------------
def cross_stitch_weights(n):
    # CrossStitchUnit.__init__: identity(n) * (0.9 - 0.1/(n-1)) + 0.1/(n-1)
    if n == 1:
        return jnp.eye(1, dtype=jnp.float32)    # guard divide-by-zero
    return (jnp.eye(n, dtype=jnp.float32) * (0.9 - 0.1 / (n - 1))
            + 0.1 / (n - 1))


def init_params(key, in_dim, layer_out_dims, split):
    """Deterministic synthetic parameters for `split` copies of each sub-net."""
    weights, biases, cs_units = [], [], []
    dims = [in_dim] + list(layer_out_dims)
    for i in range(len(layer_out_dims)):
        key, kw, kb = jax.random.split(key, 3)
        fan_in = dims[i]
        scale = 1.0 / jnp.sqrt(jnp.float32(fan_in))
        w = jax.random.uniform(kw, (split, dims[i], dims[i + 1]),
                               jnp.float32, -scale, scale)
        b = jax.random.uniform(kb, (split, dims[i + 1]),
                               jnp.float32, -scale, scale)
        weights.append(w)
        biases.append(b)
        if i < len(layer_out_dims) - 1:
            cs_units.append(cross_stitch_weights(split))
    return {"weights": weights, "biases": biases, "cross_stitch": cs_units}


def _reference_forward(x, params, split):
    """Pure-JAX reference with the original (unfolded) per-branch semantics."""
    xs = [x for _ in range(split)]
    n_layers = len(params["weights"])
    for i in range(n_layers):
        hs = []
        for j in range(split):
            h = xs[j] @ params["weights"][i][j] + params["biases"][i][j]
            if i < n_layers - 1:
                h = jnp.maximum(h, 0.0)
            hs.append(h)
        if i < n_layers - 1:
            cs = params["cross_stitch"][i]
            xs = [sum(cs[jj, kk] * hs[kk] for kk in range(split))
                  for jj in range(split)]
        else:
            xs = hs
    # torch: results has shape (B, out_dim, split); results[:, 0, :] -> (B, split)
    return jnp.stack([h[:, 0] for h in xs], axis=-1)


# ----------------------------------------------------------------------------
# Demo / self-check
# ----------------------------------------------------------------------------
if __name__ == "__main__":
    # ---- config 1: split=2, two sub-nets ------------------------------------
    B, D_IN, SPLIT = 2, 32, 2
    LAYER_OUT = (16, 8)

    key = jax.random.PRNGKey(0)
    key, kx = jax.random.split(key)
    x = jax.random.normal(kx, (B, D_IN), dtype=jnp.float32)
    params = init_params(key, D_IN, LAYER_OUT, SPLIT)

    out = jax.block_until_ready(flexible_cross_stitch_forward(x, params, SPLIT))
    ref = _reference_forward(x, params, SPLIT)
    assert out.shape == (B, SPLIT), out.shape
    assert jnp.allclose(out, ref, rtol=1e-4, atol=1e-4), (out, ref)

    # ---- large batch: exercises 2 parallel grid steps (520 rows each) -------
    key, kx2 = jax.random.split(key)
    x_big = jax.random.normal(kx2, (1040, D_IN), dtype=jnp.float32)
    out_big = jax.block_until_ready(
        flexible_cross_stitch_forward(x_big, params, SPLIT))
    ref_big = _reference_forward(x_big, params, SPLIT)
    assert out_big.shape == (1040, SPLIT), out_big.shape
    assert jnp.allclose(out_big, ref_big, rtol=1e-4, atol=1e-4)

    # ---- config 2: split=3, three sub-nets (exercises the stitch fold) ------
    B3, D_IN3, SPLIT3 = 64, 20, 3
    LAYER_OUT3 = (24, 16, 8)
    key, kx3 = jax.random.split(key)
    x3 = jax.random.normal(kx3, (B3, D_IN3), dtype=jnp.float32)
    params3 = init_params(key, D_IN3, LAYER_OUT3, SPLIT3)
    out3 = jax.block_until_ready(
        flexible_cross_stitch_forward(x3, params3, SPLIT3))
    ref3 = _reference_forward(x3, params3, SPLIT3)
    assert out3.shape == (B3, SPLIT3), out3.shape
    assert jnp.allclose(out3, ref3, rtol=1e-4, atol=1e-4), (out3, ref3)

    print("KERNEL_OK")
</pallas_src>

<mosaic_0001>
module attributes {stable_mosaic.version = 11 : i64} {
  func.func @kernel(%arg0: i32, %arg1: memref<2x32xf32, #tpu.memory_space<vmem>>, %arg2: memref<32x32xf32, #tpu.memory_space<vmem>>, %arg3: memref<1x32xf32, #tpu.memory_space<vmem>>, %arg4: memref<32x2xf32, #tpu.memory_space<vmem>>, %arg5: memref<1x2xf32, #tpu.memory_space<vmem>>, %arg6: memref<2x2xf32, #tpu.memory_space<vmem>>) attributes {dimension_semantics = [#tpu.dimension_semantics<parallel>], iteration_bounds = array<i64: 1>, scalar_prefetch = 0 : i64, scratch_operands = 0 : i64, tpu.core_type = #tpu.core_type<tc>, window_params = [{transform_indices = @transform_0, window_bounds = array<i64: 2, 32>}, {pipeline_mode = #tpu.pipeline_mode<synchronous>, transform_indices = @transform_1, window_bounds = array<i64: 32, 32>}, {pipeline_mode = #tpu.pipeline_mode<synchronous>, transform_indices = @transform_2, window_bounds = array<i64: 1, 32>}, {pipeline_mode = #tpu.pipeline_mode<synchronous>, transform_indices = @transform_3, window_bounds = array<i64: 32, 2>}, {pipeline_mode = #tpu.pipeline_mode<synchronous>, transform_indices = @transform_4, window_bounds = array<i64: 1, 2>}, {transform_indices = @transform_5, window_bounds = array<i64: 2, 2>}]} {
    %c0 = arith.constant 0 : index
    %c0_0 = arith.constant 0 : index
    %0 = vector.load %arg1[%c0, %c0_0] : memref<2x32xf32, #tpu.memory_space<vmem>>, vector<2x32xf32>
    %c0_1 = arith.constant 0 : index
    %c0_2 = arith.constant 0 : index
    %1 = vector.load %arg2[%c0_1, %c0_2] : memref<32x32xf32, #tpu.memory_space<vmem>>, vector<32x32xf32>
    %c0_3 = arith.constant 0 : index
    %c0_4 = arith.constant 0 : index
    %2 = vector.load %arg3[%c0_3, %c0_4] : memref<1x32xf32, #tpu.memory_space<vmem>>, vector<1x32xf32>
    %cst = arith.constant dense<0.000000e+00> : vector<2x32xf32>
    %3 = tpu.matmul %0, %1, %cst {dimension_numbers = #tpu.dot_dimension_numbers<[1], [0], [0], [1], [0, 0, 1, 1], [], []>} : vector<2x32xf32>, vector<32x32xf32>, vector<2x32xf32> -> vector<2x32xf32>
    %4 = vector.broadcast %2 : vector<1x32xf32> to vector<2x32xf32>
    %5 = arith.addf %3, %4 : vector<2x32xf32>
    %cst_5 = arith.constant 0.000000e+00 : f32
    %6 = vector.broadcast %cst_5 : f32 to vector<2x32xf32>
    %7 = arith.maximumf %5, %6 : vector<2x32xf32>
    %c0_6 = arith.constant 0 : index
    %c0_7 = arith.constant 0 : index
    %8 = vector.load %arg4[%c0_6, %c0_7] : memref<32x2xf32, #tpu.memory_space<vmem>>, vector<32x2xf32>
    %c0_8 = arith.constant 0 : index
    %c0_9 = arith.constant 0 : index
    %9 = vector.load %arg5[%c0_8, %c0_9] : memref<1x2xf32, #tpu.memory_space<vmem>>, vector<1x2xf32>
    %cst_10 = arith.constant dense<0.000000e+00> : vector<2x2xf32>
    %10 = tpu.matmul %7, %8, %cst_10 {dimension_numbers = #tpu.dot_dimension_numbers<[1], [0], [0], [1], [0, 0, 1, 1], [], []>} : vector<2x32xf32>, vector<32x2xf32>, vector<2x2xf32> -> vector<2x2xf32>
    %11 = vector.broadcast %9 : vector<1x2xf32> to vector<2x2xf32>
    %12 = arith.addf %10, %11 : vector<2x2xf32>
    %c0_11 = arith.constant 0 : index
    %c0_12 = arith.constant 0 : index
    %13 = vector.load %arg6[%c0_11, %c0_12] : memref<2x2xf32, #tpu.memory_space<vmem>>, vector<2x2xf32>
    tpu.vector_store %arg6[%c0_11, %c0_12], %12 {strides = array<i32>} : memref<2x2xf32, #tpu.memory_space<vmem>>, vector<2x2xf32>,
    return
  }
  func.func @transform_0(%arg0: i32) -> (i32, i32) {
    %c0_i32 = arith.constant 0 : i32
    %c0_i32_0 = arith.constant 0 : i32
    return %arg0, %c0_i32 : i32, i32
  }
  func.func @transform_1(%arg0: i32) -> (i32, i32) {
    %c0_i32 = arith.constant 0 : i32
    %c0_i32_0 = arith.constant 0 : i32
    %c0_i32_1 = arith.constant 0 : i32
    return %c0_i32, %c0_i32_0 : i32, i32
  }
  func.func @transform_2(%arg0: i32) -> (i32, i32) {
    %c0_i32 = arith.constant 0 : i32
    %c0_i32_0 = arith.constant 0 : i32
    %c0_i32_1 = arith.constant 0 : i32
    return %c0_i32, %c0_i32_0 : i32, i32
  }
  func.func @transform_3(%arg0: i32) -> (i32, i32) {
    %c0_i32 = arith.constant 0 : i32
    %c0_i32_0 = arith.constant 0 : i32
    %c0_i32_1 = arith.constant 0 : i32
    return %c0_i32, %c0_i32_0 : i32, i32
  }
  func.func @transform_4(%arg0: i32) -> (i32, i32) {
    %c0_i32 = arith.constant 0 : i32
    %c0_i32_0 = arith.constant 0 : i32
    %c0_i32_1 = arith.constant 0 : i32
    return %c0_i32, %c0_i32_0 : i32, i32
  }
  func.func @transform_5(%arg0: i32) -> (i32, i32) {
    %c0_i32 = arith.constant 0 : i32
    %c0_i32_0 = arith.constant 0 : i32
    return %arg0, %c0_i32 : i32, i32
  }
}

</mosaic_0001>

<bundles_post_ra>
// kernel: tpu_custom_call.1
= control target key start
LH: loop header
LB: loop body
LE: loop exit
PB: predicated region body
PF: predicated region fallthrough
CT: control target
= control target key end

     0   :  { %10 = vsyncpa [#allocation3], 0  ;;  %s245_s0 = inlined_call_operand.vmem [shape: f32[2,32], index: 0, kind: input, shape index: {}]   ;;  %s246_s1 = inlined_call_operand.vmem [shape: f32[32,32], index: 1, kind: input, shape index: {}]   ;;  %s247_s2 = inlined_call_operand.hbm [shape: f32[1,32], index: 2, kind: input, shape index: {}]   ;;  %s248_s3 = inlined_call_operand.vmem [shape: f32[32,2], index: 3, kind: input, shape index: {}]   ;;  %s249_s4 = inlined_call_operand.vmem [shape: f32[1,2], index: 4, kind: input, shape index: {}]   ;;  %s250_s5 = inlined_call_operand.hbm [shape: f32[2,2], index: 5, kind: output, shape index: {}]  }
   0x1   :  { %11 = vsyncpa [#allocation4], 0  ;;  %s21_s20 = sshll.u32 %s247_s2, 4  ;;  %s177_s21 = smov [#allocation2]   ;;  %s22_s20 = int_to_ptr.hbm [resolvable:$true] %s21_s20 }
   0x2   :  { %s23_s22 = sshll.u32 %s177_s21, 4  ;;  %s24_s22 = int_to_ptr.vmem [resolvable:$true] %s23_s22 }
   0x3   :  { %26 = dma.hbm_to_vmem [thread:$0]  %s22_s20, 16, %s24_s22, [#allocation3]  }
   0x4   :  { %173 = dma.done.wait [#allocation3], 16  }
   0x5   :  { %174 = vsyncadd [#allocation3], 4294967280  ;;  %v39_v0 = vld [vmem:[%s246_s1 + $0x18] sm:$0xff]  ;;  %v38_v1 = vld [vmem:[%s246_s1 + $0x10] sm:$0xff]  ;;  %vm44_vm0 = vcmask 261120   ;;  %s178_s15 = smov [#allocation5]  }
   0x6   :  { %60 = vmatpush.msra.mxu0 %v39_v0  ;;  %v72_v2 = vld [vmem:[%s248_s3 + $0x18] sm:$0xff]  ;;  %v37_v3 = vld [vmem:[%s246_s1 + $0x8] sm:$0xff]  ;;  %v36_v4 = vld [vmem:[%s246_s1] sm:$0xff]  ;;  %s107_s16 = sshll.u32 %s178_s15, 4  ;;  %s109_s19 = sshll.u32 %s250_s5, 4  ;;  %vm100_vm1 = vcmask 9216   ;;  %s108_s16 = int_to_ptr.vmem [resolvable:$true] %s107_s16  ;;  %s110_s19 = int_to_ptr.hbm [resolvable:$true] %s109_s19 }
   0x7   :  { %92 = vmatpush.msra.mxu1 %v72_v2  ;;  %v35_v5 = vld [vmem:[%s245_s0] sm:$0x3]  ;;  %v71_v6 = vld [vmem:[%s248_s3 + $0x10] sm:$0xff]  ;;  %v70_v7 = vld [vmem:[%s248_s3 + $0x8] sm:$0xff] }
   0x8   :  { %61 = vmatpush.msra.mxu0 %v38_v1  ;;  %v69_v8 = vld [vmem:[%s248_s3] sm:$0xff] }
   0x9   :  { %93 = vmatpush.msra.mxu1 %v71_v6  ;;  %v123_v9 = vld [vmem:[#allocation2] ss:$0 sm:$0xff] }
   0xa   :  { %62 = vmatpush.msra.mxu0 %v37_v3  ;;  %v124_v13 = vld [vmem:[%s249_s4] ss:$0 sm:$0xff] }
   0xb   :  { %94 = vmatpush.msra.mxu1 %v70_v7 }
   0xc   :  { %63 = vmatpush.msra.mxu0 %v36_v4 }
   0xd   :  { %119 = vmatmul.msk.f32.vlgmr.msra.gmra.mxu0 %vm44_vm0, %v35_v5  ;;  %95 = vmatpush.msra.mxu1 %v69_v8 }
  0x8a   :  { %v65_v10 = vpop.f32.mrf.mxu0 }
  0x8b   :  { %v66_v11 = vadd.f32 %v123_v9, %v65_v10 }
  0x8d   :  { %v68_v12 = vmax.f32 %v66_v11, 0.0 }
  0x8f   :  { %120 = vmatmul.msk.f32.vlgmr.msra.gmra.mxu1 %vm44_vm0, %v68_v12 }
 0x10c   :  { %v97_v14 = vpop.f32.mrf.mxu1 }
 0x10d   :  { %v98_v15 = vadd.f32 %v124_v13, %v97_v14 }
 0x10f   :  { %101 = vst.msk [vmem:[#allocation5] sm:$0x3] %vm100_vm1, %v98_v15 }
 0x110   :  { %112 = dma.vmem_to_hbm [thread:$0]  %s108_s16, 32, %s110_s19, [#allocation4]  }
 0x111   :  { %175 = dma.done.wait [#allocation4], 32  }
 0x112   :  { %176 = vsyncadd [#allocation4], 4294967264 }
 0x113   :  { %117 = vsyncpa [#allocation3], 1 }
 0x114   :  { %118 = vsyncpa [#allocation4], 1 }

</bundles_post_ra>
